<compile_context>
chip_gen: v5e
topology: v5e:2x2
jax: 0.10.0
libtpu: 0.0.40
codegen_flags: <defaults>
</compile_context>

<pallas_src>
import jax
import jax.numpy as jnp
from jax.experimental import pallas as pl
from jax.experimental.pallas import tpu as pltpu


def _round_up(a, b):
    return ((a + b - 1) // b) * b


def _atomwise_kernel(x_ref, idxm_ref, w1_ref, b1_ref, w2t_ref, b2_ref,
                     out_ref, acc_ref, cnt_ref):
    step = pl.program_id(1)

    @pl.when(step == 0)
    def _():
        acc_ref[...] = jnp.zeros_like(acc_ref)
        cnt_ref[...] = jnp.zeros_like(cnt_ref)

    # ---- per-atom hidden layer: silu(x @ W1 + b1)  (bf16 MXU, f32 accum) ----
    h = jnp.dot(x_ref[...], w1_ref[...], preferred_element_type=jnp.float32)
    h = h + b1_ref[...]                         # broadcast [1, n_hidden]
    h = h * jax.nn.sigmoid(h)                   # SiLU (EUP sigmoid + VPU mul)

    # ---- reassociated segment scatter-add: acc[m, :] += sum_{idx==m} h ------
    maxm_pad = acc_ref.shape[0]
    ta = idxm_ref.shape[1]
    mol_iota = jax.lax.broadcasted_iota(jnp.int32, (maxm_pad, ta), 0)
    mask = mol_iota == idxm_ref[...]            # [maxm_pad, TA] bool
    acc_ref[...] += jnp.dot(mask.astype(jnp.bfloat16), h.astype(jnp.bfloat16),
                            preferred_element_type=jnp.float32)
    cnt_ref[...] += jnp.sum(mask.astype(jnp.float32), axis=1, keepdims=True)

    # ---- finalize: contract with W2 once, add atom_count * b2 ---------------
    @pl.when(step == pl.num_programs(1) - 1)
    def _():
        acc = acc_ref[...]                      # [maxm_pad, n_hidden] f32
        n_out = out_ref.shape[-1]
        if n_out == 1:
            # n_out == 1: VPU multiply + lane reduce instead of an N=1 MXU matmul.
            y = jnp.sum(acc * w2t_ref[...], axis=-1, keepdims=True)
        else:
            y = jax.lax.dot_general(acc, w2t_ref[...],
                                    (((1,), (1,)), ((), ())),
                                    preferred_element_type=jnp.float32)
        out_ref[...] = (y + cnt_ref[...] * b2_ref[...]).astype(out_ref.dtype)


def atomwise_adapted_forward(x, idx_m, params, maxm, *,
                             tile_atoms=512, num_shards=2):
    """x: [n_atoms, n_in] f32, idx_m: [n_atoms] int32 (sorted). Returns y: [maxm]."""
    n_atoms, n_in = x.shape
    w1, b1, w2, b2 = params
    n_hidden = w1.shape[1]
    n_out = w2.shape[1]

    # ---- derive tiling / padding (TA multiple of 128, bounded VMEM) ---------
    per_shard = -(-n_atoms // num_shards)                       # ceil
    ta = min(_round_up(max(tile_atoms, 128), 128), _round_up(per_shard, 128))
    n_steps = -(-per_shard // ta)
    n_atoms_pad = num_shards * n_steps * ta
    maxm_pad = _round_up(maxm, 8)

    # x fed as bf16 (halves HBM traffic); padded rows are zero.
    x_pad = jnp.zeros((n_atoms_pad, n_in), jnp.bfloat16)
    x_pad = x_pad.at[:n_atoms].set(x.astype(jnp.bfloat16))
    # Padded atoms get molecule index `maxm`: they either match no one-hot row
    # or land in a padded output row that is sliced off below.
    idx_pad = jnp.full((1, n_atoms_pad), maxm, jnp.int32)
    idx_pad = idx_pad.at[0, :n_atoms].set(idx_m.astype(jnp.int32))

    w1_b = w1.astype(jnp.bfloat16)
    b1_2d = b1.reshape(1, n_hidden).astype(jnp.float32)
    w2t = w2.T.reshape(n_out, n_hidden).astype(jnp.float32)
    b2_2d = b2.reshape(1, n_out).astype(jnp.float32)

    out = pl.pallas_call(
        _atomwise_kernel,
        out_shape=jax.ShapeDtypeStruct((num_shards, maxm_pad, n_out), jnp.float32),
        grid=(num_shards, n_steps),
        in_specs=[
            pl.BlockSpec((ta, n_in), lambda p, s: (p * n_steps + s, 0)),
            pl.BlockSpec((1, ta), lambda p, s: (0, p * n_steps + s)),
            pl.BlockSpec((n_in, n_hidden), lambda p, s: (0, 0)),
            pl.BlockSpec((1, n_hidden), lambda p, s: (0, 0)),
            pl.BlockSpec((n_out, n_hidden), lambda p, s: (0, 0)),
            pl.BlockSpec((1, n_out), lambda p, s: (0, 0)),
        ],
        out_specs=pl.BlockSpec((None, maxm_pad, n_out), lambda p, s: (p, 0, 0)),
        scratch_shapes=[
            pltpu.VMEM((maxm_pad, n_hidden), jnp.float32),   # per-molecule acc
            pltpu.VMEM((maxm_pad, 1), jnp.float32),          # per-molecule atom count
        ],
        compiler_params=pltpu.CompilerParams(
            dimension_semantics=("parallel", "arbitrary"),
            vmem_limit_bytes=32 * 1024 * 1024,
        ),
    )(x_pad, idx_pad, w1_b, b1_2d, w2t, b2_2d)

    y_mol = jnp.sum(out, axis=0)[:maxm]          # combine per-shard partial sums
    # torch.squeeze(y, -1): drops last dim only when n_out == 1
    if n_out == 1:
        y_mol = jnp.squeeze(y_mol, -1)
    return y_mol


def _init_params(key, n_in, n_hidden, n_out):
    k1, k2, k3, k4 = jax.random.split(key, 4)
    w1 = jax.random.normal(k1, (n_in, n_hidden), jnp.float32) / jnp.sqrt(n_in)
    b1 = jax.random.normal(k2, (n_hidden,), jnp.float32) * 0.01
    w2 = jax.random.normal(k3, (n_hidden, n_out), jnp.float32) / jnp.sqrt(n_hidden)
    b2 = jax.random.normal(k4, (n_out,), jnp.float32) * 0.01
    return w1, b1, w2, b2


if __name__ == "__main__":
    key = jax.random.PRNGKey(0)
    k_x, k_p = jax.random.split(key)

    # Small shapes: 2 molecules, 8 atoms each, n_in=32, hidden=n_in//2=16, n_out=1
    n_atoms, n_in, n_out = 16, 32, 1
    n_hidden = n_in // 2                      # spk build_mlp default (n_hidden=None, n_layers=2)
    maxm = 2

    x = jax.random.normal(k_x, (n_atoms, n_in), jnp.float32)   # 'scalar_representation'
    idx_m = jnp.array([0] * 8 + [1] * 8, dtype=jnp.int32)      # sorted molecule index per atom
    params = _init_params(k_p, n_in, n_hidden, n_out)

    y = atomwise_adapted_forward(x, idx_m, params, maxm)
    y = jax.block_until_ready(y)

    # Plain-JAX reference with matching bf16 matmul inputs (f32 accumulation),
    # so the check isolates kernel logic (MLP, biases, segment sum).
    w1, b1, w2, b2 = params
    xb = x.astype(jnp.bfloat16).astype(jnp.float32)
    w1b = w1.astype(jnp.bfloat16).astype(jnp.float32)
    h = xb @ w1b + b1
    h = h * jax.nn.sigmoid(h)
    hb = h.astype(jnp.bfloat16).astype(jnp.float32)
    y_atom = hb @ w2 + b2
    y_ref = jnp.squeeze(jax.ops.segment_sum(y_atom, idx_m, num_segments=maxm), -1)
    assert jnp.allclose(y, y_ref, atol=2e-3, rtol=2e-3), (y, y_ref)

    # Loose sanity check against the exact f32 reference (bf16 quantization only).
    h32 = x @ w1 + b1
    h32 = h32 * jax.nn.sigmoid(h32)
    y_ref32 = jnp.squeeze(
        jax.ops.segment_sum(h32 @ w2 + b2, idx_m, num_segments=maxm), -1)
    assert jnp.allclose(y, y_ref32, atol=2e-1, rtol=2e-1), (y, y_ref32)

    print("KERNEL_OK")
</pallas_src>

<mosaic_0001>
module attributes {stable_mosaic.version = 11 : i64} {
  func.func @_atomwise_kernel(%arg0: i32, %arg1: i32, %arg2: memref<128x32xbf16, #tpu.memory_space<vmem>>, %arg3: memref<1x128xi32, #tpu.memory_space<vmem>>, %arg4: memref<32x16xbf16, #tpu.memory_space<vmem>>, %arg5: memref<1x16xf32, #tpu.memory_space<vmem>>, %arg6: memref<1x16xf32, #tpu.memory_space<vmem>>, %arg7: memref<1x1xf32, #tpu.memory_space<vmem>>, %arg8: memref<1x8x1xf32, #tpu.memory_space<vmem>>, %arg9: memref<8x16xf32, #tpu.memory_space<vmem>>, %arg10: memref<8x1xf32, #tpu.memory_space<vmem>>) attributes {dimension_semantics = [#tpu.dimension_semantics<parallel>, #tpu.dimension_semantics<arbitrary>], iteration_bounds = array<i64: 2, 1>, scalar_prefetch = 0 : i64, scratch_operands = 2 : i64, tpu.core_type = #tpu.core_type<tc>, window_params = [{transform_indices = @transform_0, window_bounds = array<i64: 128, 32>}, {transform_indices = @transform_1, window_bounds = array<i64: 1, 128>}, {pipeline_mode = #tpu.pipeline_mode<synchronous>, transform_indices = @transform_2, window_bounds = array<i64: 32, 16>}, {pipeline_mode = #tpu.pipeline_mode<synchronous>, transform_indices = @transform_3, window_bounds = array<i64: 1, 16>}, {pipeline_mode = #tpu.pipeline_mode<synchronous>, transform_indices = @transform_4, window_bounds = array<i64: 1, 16>}, {pipeline_mode = #tpu.pipeline_mode<synchronous>, transform_indices = @transform_5, window_bounds = array<i64: 1, 1>}, {transform_indices = @transform_6, window_bounds = array<i64: 1, 8, 1>}]} {
    %c0_i32 = arith.constant 0 : i32
    %0 = arith.cmpi eq, %arg1, %c0_i32 : i32
    %1 = arith.extui %0 : i1 to i32
    %c0_i32_0 = arith.constant 0 : i32
    %2 = arith.cmpi ne, %1, %c0_i32_0 : i32
    scf.if %2 {
      %cst_21 = arith.constant 0.000000e+00 : f32
      %37 = vector.broadcast %cst_21 : f32 to vector<8x16xf32>
      %c0_22 = arith.constant 0 : index
      %c0_23 = arith.constant 0 : index
      %38 = vector.load %arg9[%c0_22, %c0_23] : memref<8x16xf32, #tpu.memory_space<vmem>>, vector<8x16xf32>
      tpu.vector_store %arg9[%c0_22, %c0_23], %37 {strides = array<i32>} : memref<8x16xf32, #tpu.memory_space<vmem>>, vector<8x16xf32>,
      %cst_24 = arith.constant 0.000000e+00 : f32
      %39 = vector.broadcast %cst_24 : f32 to vector<8x1xf32>
      %c0_25 = arith.constant 0 : index
      %c0_26 = arith.constant 0 : index
      %40 = vector.load %arg10[%c0_25, %c0_26] : memref<8x1xf32, #tpu.memory_space<vmem>>, vector<8x1xf32>
      tpu.vector_store %arg10[%c0_25, %c0_26], %39 {strides = array<i32>} : memref<8x1xf32, #tpu.memory_space<vmem>>, vector<8x1xf32>,
    } else {
    }
    %c0 = arith.constant 0 : index
    %c0_1 = arith.constant 0 : index
    %3 = vector.load %arg2[%c0, %c0_1] : memref<128x32xbf16, #tpu.memory_space<vmem>>, vector<128x32xbf16>
    %c0_2 = arith.constant 0 : index
    %c0_3 = arith.constant 0 : index
    %4 = vector.load %arg4[%c0_2, %c0_3] : memref<32x16xbf16, #tpu.memory_space<vmem>>, vector<32x16xbf16>
    %cst = arith.constant dense<0.000000e+00> : vector<128x16xf32>
    %5 = tpu.matmul %3, %4, %cst {dimension_numbers = #tpu.dot_dimension_numbers<[1], [0], [0], [1], [0, 0, 1, 1], [], []>} : vector<128x32xbf16>, vector<32x16xbf16>, vector<128x16xf32> -> vector<128x16xf32>
    %c0_4 = arith.constant 0 : index
    %c0_5 = arith.constant 0 : index
    %6 = vector.load %arg5[%c0_4, %c0_5] : memref<1x16xf32, #tpu.memory_space<vmem>>, vector<1x16xf32>
    %7 = vector.broadcast %6 : vector<1x16xf32> to vector<128x16xf32>
    %8 = arith.addf %5, %7 : vector<128x16xf32>
    %9 = arith.negf %8 : vector<128x16xf32>
    %10 = math.exp %9 : vector<128x16xf32>
    %cst_6 = arith.constant 1.000000e+00 : f32
    %11 = vector.broadcast %cst_6 : f32 to vector<128x16xf32>
    %12 = arith.addf %11, %10 : vector<128x16xf32>
    %13 = arith.divf %11, %12 : vector<128x16xf32>
    %14 = arith.mulf %8, %13 : vector<128x16xf32>
    %15 = tpu.iota {dimensions = array<i32: 0>} : vector<8x128xi32>
    %c0_7 = arith.constant 0 : index
    %c0_8 = arith.constant 0 : index
    %16 = vector.load %arg3[%c0_7, %c0_8] : memref<1x128xi32, #tpu.memory_space<vmem>>, vector<1x128xi32>
    %17 = vector.broadcast %16 : vector<1x128xi32> to vector<8x128xi32>
    %18 = arith.cmpi eq, %15, %17 : vector<8x128xi32>
    %c0_9 = arith.constant 0 : index
    %c0_10 = arith.constant 0 : index
    %19 = vector.load %arg9[%c0_9, %c0_10] : memref<8x16xf32, #tpu.memory_space<vmem>>, vector<8x16xf32>
    %20 = arith.extui %18 : vector<8x128xi1> to vector<8x128xi32>
    %21 = arith.sitofp %20 : vector<8x128xi32> to vector<8x128xf32>
    %22 = arith.truncf %21 : vector<8x128xf32> to vector<8x128xbf16>
    %23 = arith.truncf %14 : vector<128x16xf32> to vector<128x16xbf16>
    %cst_11 = arith.constant dense<0.000000e+00> : vector<8x16xf32>
    %24 = tpu.matmul %22, %23, %cst_11 {dimension_numbers = #tpu.dot_dimension_numbers<[1], [0], [0], [1], [0, 0, 1, 1], [], []>} : vector<8x128xbf16>, vector<128x16xbf16>, vector<8x16xf32> -> vector<8x16xf32>
    %25 = arith.addf %19, %24 : vector<8x16xf32>
    %c0_12 = arith.constant 0 : index
    %c0_13 = arith.constant 0 : index
    %26 = vector.load %arg9[%c0_12, %c0_13] : memref<8x16xf32, #tpu.memory_space<vmem>>, vector<8x16xf32>
    tpu.vector_store %arg9[%c0_12, %c0_13], %25 {strides = array<i32>} : memref<8x16xf32, #tpu.memory_space<vmem>>, vector<8x16xf32>,
    %c0_14 = arith.constant 0 : index
    %c0_15 = arith.constant 0 : index
    %27 = vector.load %arg10[%c0_14, %c0_15] : memref<8x1xf32, #tpu.memory_space<vmem>>, vector<8x1xf32>
    %28 = arith.extui %18 : vector<8x128xi1> to vector<8x128xi32>
    %29 = arith.sitofp %28 : vector<8x128xi32> to vector<8x128xf32>
    %cst_16 = arith.constant dense<0.000000e+00> : vector<8xf32>
    %30 = vector.multi_reduction <add>, %29, %cst_16 [1] : vector<8x128xf32> to vector<8xf32>
    %31 = vector.shape_cast %30 : vector<8xf32> to vector<8x1xf32>
    %32 = arith.addf %27, %31 : vector<8x1xf32>
    %c0_17 = arith.constant 0 : index
    %c0_18 = arith.constant 0 : index
    %33 = vector.load %arg10[%c0_17, %c0_18] : memref<8x1xf32, #tpu.memory_space<vmem>>, vector<8x1xf32>
    tpu.vector_store %arg10[%c0_17, %c0_18], %32 {strides = array<i32>} : memref<8x1xf32, #tpu.memory_space<vmem>>, vector<8x1xf32>,
    %c0_i32_19 = arith.constant 0 : i32
    %34 = arith.cmpi eq, %arg1, %c0_i32_19 : i32
    %35 = arith.extui %34 : i1 to i32
    %c0_i32_20 = arith.constant 0 : i32
    %36 = arith.cmpi ne, %35, %c0_i32_20 : i32
    scf.if %36 {
      %c0_21 = arith.constant 0 : index
      %c0_22 = arith.constant 0 : index
      %37 = vector.load %arg9[%c0_21, %c0_22] : memref<8x16xf32, #tpu.memory_space<vmem>>, vector<8x16xf32>
      %c0_23 = arith.constant 0 : index
      %c0_24 = arith.constant 0 : index
      %38 = vector.load %arg6[%c0_23, %c0_24] : memref<1x16xf32, #tpu.memory_space<vmem>>, vector<1x16xf32>
      %39 = vector.broadcast %38 : vector<1x16xf32> to vector<8x16xf32>
      %40 = arith.mulf %37, %39 : vector<8x16xf32>
      %cst_25 = arith.constant dense<0.000000e+00> : vector<8xf32>
      %41 = vector.multi_reduction <add>, %40, %cst_25 [1] : vector<8x16xf32> to vector<8xf32>
      %42 = vector.shape_cast %41 : vector<8xf32> to vector<8x1xf32>
      %c0_26 = arith.constant 0 : index
      %c0_27 = arith.constant 0 : index
      %43 = vector.load %arg10[%c0_26, %c0_27] : memref<8x1xf32, #tpu.memory_space<vmem>>, vector<8x1xf32>
      %c0_28 = arith.constant 0 : index
      %c0_29 = arith.constant 0 : index
      %44 = vector.load %arg7[%c0_28, %c0_29] : memref<1x1xf32, #tpu.memory_space<vmem>>, vector<1x1xf32>
      %45 = vector.broadcast %44 : vector<1x1xf32> to vector<8x1xf32>
      %46 = arith.mulf %43, %45 : vector<8x1xf32>
      %47 = arith.addf %42, %46 : vector<8x1xf32>
      %c0_30 = arith.constant 0 : index
      %c0_31 = arith.constant 0 : index
      %c0_32 = arith.constant 0 : index
      %48 = vector.load %arg8[%c0_30, %c0_31, %c0_32] : memref<1x8x1xf32, #tpu.memory_space<vmem>>, vector<1x8x1xf32>
      %49 = vector.shape_cast %48 : vector<1x8x1xf32> to vector<8x1xf32>
      %50 = vector.shape_cast %47 : vector<8x1xf32> to vector<1x8x1xf32>
      tpu.vector_store %arg8[%c0_30, %c0_31, %c0_32], %50 {strides = array<i32>} : memref<1x8x1xf32, #tpu.memory_space<vmem>>, vector<1x8x1xf32>,
    } else {
    }
    return
  }
  func.func @transform_0(%arg0: i32, %arg1: i32) -> (i32, i32) {
    %c1_i32 = arith.constant 1 : i32
    %0 = arith.muli %arg0, %c1_i32 : i32
    %1 = arith.addi %0, %arg1 : i32
    %c0_i32 = arith.constant 0 : i32
    %c0_i32_0 = arith.constant 0 : i32
    return %1, %c0_i32 : i32, i32
  }
  func.func @transform_1(%arg0: i32, %arg1: i32) -> (i32, i32) {
    %c1_i32 = arith.constant 1 : i32
    %0 = arith.muli %arg0, %c1_i32 : i32
    %1 = arith.addi %0, %arg1 : i32
    %c0_i32 = arith.constant 0 : i32
    %c0_i32_0 = arith.constant 0 : i32
    return %c0_i32, %1 : i32, i32
  }
  func.func @transform_2(%arg0: i32, %arg1: i32) -> (i32, i32) {
    %c0_i32 = arith.constant 0 : i32
    %c0_i32_0 = arith.constant 0 : i32
    %c0_i32_1 = arith.constant 0 : i32
    return %c0_i32, %c0_i32_0 : i32, i32
  }
  func.func @transform_3(%arg0: i32, %arg1: i32) -> (i32, i32) {
    %c0_i32 = arith.constant 0 : i32
    %c0_i32_0 = arith.constant 0 : i32
    %c0_i32_1 = arith.constant 0 : i32
    return %c0_i32, %c0_i32_0 : i32, i32
  }
  func.func @transform_4(%arg0: i32, %arg1: i32) -> (i32, i32) {
    %c0_i32 = arith.constant 0 : i32
    %c0_i32_0 = arith.constant 0 : i32
    %c0_i32_1 = arith.constant 0 : i32
    return %c0_i32, %c0_i32_0 : i32, i32
  }
  func.func @transform_5(%arg0: i32, %arg1: i32) -> (i32, i32) {
    %c0_i32 = arith.constant 0 : i32
    %c0_i32_0 = arith.constant 0 : i32
    %c0_i32_1 = arith.constant 0 : i32
    return %c0_i32, %c0_i32_0 : i32, i32
  }
  func.func @transform_6(%arg0: i32, %arg1: i32) -> (i32, i32, i32) {
    %c0_i32 = arith.constant 0 : i32
    %c0_i32_0 = arith.constant 0 : i32
    %c0_i32_1 = arith.constant 0 : i32
    return %arg0, %c0_i32, %c0_i32_0 : i32, i32, i32
  }
}

</mosaic_0001>

<bundles_post_ra>
// kernel: tpu_custom_call.1
= control target key start
LH: loop header
LB: loop body
LE: loop exit
PB: predicated region body
PF: predicated region fallthrough
CT: control target
= control target key end

     0   :  { %s1151_s23 = smov 0   ;;  %s1153_s24 = smov 0   ;;  %s1740_s0 = inlined_call_operand.vmem [shape: bf16[256,32], index: 0, kind: input, shape index: {}]   ;;  %s1741_s1 = inlined_call_operand.vmem [shape: s32[1,256], index: 1, kind: input, shape index: {}]   ;;  %s1742_s2 = inlined_call_operand.vmem [shape: bf16[32,16], index: 2, kind: input, shape index: {}]   ;;  %s1743_s3 = inlined_call_operand.vmem [shape: f32[1,16], index: 3, kind: input, shape index: {}]   ;;  %s1744_s4 = inlined_call_operand.vmem [shape: f32[1,16], index: 4, kind: input, shape index: {}]   ;;  %s1745_s5 = inlined_call_operand.<no memory space> [shape: f32[1,1], index: 5, kind: input, shape index: {}]   ;;  %s1746_s6 = inlined_call_operand.vmem [shape: f32[2,8,1], index: 6, kind: output, shape index: {}]  }
   0x1   :  { %v11_v0 = vstv %s1745_s5  ;;  %s1155_s25 = smov 0  }
   0x2   :  { %12 = vst [vmem:[#allocation4] sm:$0x1] %v11_v0 }
   0x3 LB: > { %s30_s5 = sadd.s32 1, %s1105_s24  ;;  %p906_p0 = scmp.ge.s32.totalorder %s1109_s25, 1  ;;  %s1109_s25 = sphi %s1155_s25, %s18_s25   ;;  %s1105_s24 = sphi %s1153_s24, %s1801_s24   ;;  %s1101_s23 = sphi %s1151_s23, %s1800_s23  }
   0x4   : > { %p32_p1 = scmp.ge.s32.totalorder %s30_s5, 2  ;;  %p243_p2 = scmp.lt.s32.totalorder %s1109_s25, 3 }
   0x6   : > { %s1803_s5 = smov (%p32_p1, %s30_s5), 0  ;;  %p244_p3 = pnand %p906_p0, %p243_p2 }
   0x8   : > { %247 = sbr.rel (%p244_p3) target bundleno = 510 (0x1fe), region = 44 }
   0xd   : > { %v988_v1 = vld [vmem:[%s1742_s2 + $0x8] sm:$0xff]  ;;  %s907_s28 = sshll.u32 %s1101_s23, 4  ;;  %v987_v2 = vld [vmem:[%s1742_s2] sm:$0xff]  ;;  %vm379_vm0 = vcmask 261120   ;;  %p286_p5 = scmp.lt.s32.totalorder %s1101_s23, 1 }
   0xe   : > { %p279_p4 = scmp.lt.s32.totalorder %s907_s28, 31  ;;  %410 = vmatpush.bf16.msra.mxu0 %v988_v1  ;;  %989 = vmatpush.bf16.msra.mxu2 %v988_v1  ;;  %v1200_v15 = vld [vmem:[%s1743_s3] ss:$0 sm:$0xff] }
   0xf   : > { %990 = vmatpush.bf16.msra.mxu3 %v988_v1  ;;  %s1807_s23 = smov (!%p286_p5, %s1101_s23), 1 }
  0x10   : > { %s1805_s28 = smov (!%p279_p4, %s907_s28), 31  ;;  %s288_s13 = scalar_lea.vmem %s1741_s1, %s1807_s23 }
  0x11   : > { %s908_s7 = sshll.u32 %s1805_s28, 2  ;;  %s909_s20 = sshll.u32 %s1807_s23, 3 }
  0x12   : > { %411 = vmatpush.bf16.msra.mxu0 %v987_v2  ;;  %991 = vmatpush.bf16.msra.mxu2 %v987_v2  ;;  %s282_s10 = scalar_lea.vmem %s1740_s0, %s908_s7  ;;  %s293_s26 = scalar_lea.vmem %s1746_s6, %s909_s20 }
  0x13   : > { %992 = vmatpush.bf16.msra.mxu3 %v987_v2  ;;  %v979_v3 = vld [vmem:[%s282_s10] sm:$0xff]  ;;  %v982_v4 = vld [vmem:[%s282_s10 + $0x18] sm:$0xff]  ;;  %v985_v5 = vld [vmem:[%s282_s10 + $0x30] sm:$0xff] }
  0x14   : > { %v980_v6 = vld [vmem:[%s282_s10 + $0x8] sm:$0xff]  ;;  %v983_v7 = vld [vmem:[%s282_s10 + $0x20] sm:$0xff]  ;;  %v986_v8 = vld [vmem:[%s282_s10 + $0x38] sm:$0xff] }
  0x15   : > { %950 = vmatmul.msk.bf16.vlgmr.msra.gmra.mxu0 %vm379_vm0, %v979_v3  ;;  %953 = vmatmul.msk.bf16.vlgmr.msra.gmra.mxu2 %vm379_vm0, %v982_v4  ;;  %v981_v9 = vld [vmem:[%s282_s10 + $0x10] sm:$0xff]  ;;  %v984_v10 = vld [vmem:[%s282_s10 + $0x28] sm:$0xff] }
  0x16   : > { %956 = vmatmul.msk.bf16.vlgmr.msra.gmra.mxu3 %vm379_vm0, %v985_v5 }
  0x25   : > { %951 = vmatmul.msk.bf16.gmra.mxu0 %vm379_vm0, %v980_v6  ;;  %954 = vmatmul.msk.bf16.gmra.mxu2 %vm379_vm0, %v983_v7 }
  0x26   : > { %957 = vmatmul.msk.bf16.gmra.mxu3 %vm379_vm0, %v986_v8 }
  0x35   : > { %952 = vmatmul.msk.bf16.gmra.mxu0 %vm379_vm0, %v981_v9  ;;  %955 = vmatmul.msk.bf16.gmra.mxu2 %vm379_vm0, %v984_v10 }
  0x92   : > { %v413_v11 = vpop.f32.mrf.mxu0 }
  0x93   : > { %v1209_v21 = vadd.f32 %v1200_v15, %v413_v11 }
  0x95   : > { %1749 = vst [vmem:[#allocation5_spill] sm:$0xff] %v1209_v21  ;;  %v958_v26 = vmul.f32 -1.442695, %v1209_v21 }
  0x98   : > { %v428_v12 = vpop.f32.mrf.mxu2 }
  0x99   : > { %v443_v13 = vpop.f32.mrf.mxu3  ;;  %v1203_v16 = vadd.f32 %v1200_v15, %v428_v12 }
  0x9a   : > { %v415_v14 = vpop.f32.mrf.mxu0  ;;  %v1206_v18 = vadd.f32 %v1200_v15, %v443_v13 }
  0x9b   : > { %v964_v22 = vmul.f32 -1.442695, %v1203_v16  ;;  %v1223_v30 = vadd.f32 %v1200_v15, %v415_v14 }
  0x9c   : > { %v970_v23 = vmul.f32 -1.442695, %v1206_v18 }
  0x9d   : > { %1023 = vpow2.f32 %v964_v22  ;;  %1750 = vst [vmem:[#allocation6_spill] sm:$0xff] %v1223_v30  ;;  %v959_v34 = vmul.f32 -1.442695, %v1223_v30 }
  0x9e   : > { %1025 = vpow2.f32 %v970_v23 }
  0x9f   : > { %1027 = vpow2.f32 %v958_v26 }
  0xa0   : > { %v430_v17 = vpop.f32.mrf.mxu2 }
  0xa1   : > { %v445_v20 = vpop.f32.mrf.mxu3  ;;  %v1214_v24 = vadd.f32 %v1200_v15, %v430_v17 }
  0xa2   : > { %v418_v19 = vpop.f32.mrf.mxu0  ;;  %v1217_v25 = vadd.f32 %v1200_v15, %v445_v20 }
  0xa3   : > { %v965_v28 = vmul.f32 -1.442695, %v1214_v24  ;;  %v1024_v32 = vpop.eup %1023  ;;  %v1227_v35 = vadd.f32 %v1200_v15, %v418_v19 }
  0xa4   : > { %v971_v29 = vmul.f32 -1.442695, %v1217_v25  ;;  %v1026_v33 = vpop.eup %1025  ;;  %v1229_v37 = vadd.f32 1.0, %v1024_v32 }
  0xa5   : > { %1029 = vpow2.f32 %v965_v28  ;;  %v1028_v39 = vpop.eup %1027  ;;  %v1231_v40 = vadd.f32 1.0, %v1026_v33  ;;  %v960_v43 = vmul.f32 -1.442695, %v1227_v35 }
  0xa6   : > { %1031 = vpow2.f32 %v971_v29  ;;  %v1237_v45 = vadd.f32 1.0, %v1028_v39  ;;  %v616_v12 = vand.u32 2147483647, %v1229_v37  ;;  %v618_v13 = vand.u32 2147483648, %v1229_v37 }
  0xa7   : > { %1033 = vpow2.f32 %v959_v34  ;;  %vm612_vm1 = vweird.f32 %v1229_v37  ;;  %vm702_vm2 = vweird.f32 %v1231_v40 }
  0xa8   : > { %v433_v27 = vpop.f32.mrf.mxu2  ;;  %1035 = vrcp.f32 %v1229_v37  ;;  %v1312_v34 = vor.u32 1.1754944e-38, %v618_v13  ;;  %vm1338_vm5 = vcmp.eq.f32.partialorder %v616_v12, 8.507059e+37 }
  0xa9   : > { %v448_v38 = vpop.f32.mrf.mxu3  ;;  %v1241_v46 = vadd.f32 %v1200_v15, %v433_v27  ;;  %1037 = vrcp.f32 %v1231_v40 }
  0xaa   : > { %v420_v31 = vpop.f32.mrf.mxu0  ;;  %v1235_v44 = vadd.f32 %v1200_v15, %v448_v38  ;;  %1039 = vpow2.f32 %v960_v43  ;;  %v706_v43 = vand.u32 2147483647, %v1231_v40 }
  0xab   : > { %v1030_v41 = vpop.eup %1029  ;;  %1041 = vrcp.f32 %v1237_v45  ;;  %v966_v51 = vmul.f32 -1.442695, %v1241_v46  ;;  %v1278_v3 = vadd.f32 %v1200_v15, %v420_v31 }
  0xac   : > { %v1032_v42 = vpop.eup %1031  ;;  %v1244_v47 = vadd.f32 1.0, %v1030_v41  ;;  %v972_v50 = vmul.f32 -1.442695, %v1235_v44  ;;  %vm1346_vm6 = vcmp.eq.f32.partialorder %v706_v43, 8.507059e+37 }
  0xad   : > { %v1246_v49 = vadd.f32 1.0, %v1032_v42  ;;  %v1034_v53 = vpop.eup %1033  ;;  %v961_v26 = vmul.f32 -1.442695, %v1278_v3 }
  0xae   : > { %1043 = vrcp.f32 %v1244_v47  ;;  %v1255_v55 = vpop.eup %1035  ;;  %v1260_v58 = vadd.f32 1.0, %v1034_v53  ;;  %v708_v53 = vand.u32 2147483648, %v1231_v40  ;;  %vm627_vm11 = vweird.f32 %v1244_v47 }
  0xaf   : > { %1045 = vrcp.f32 %v1246_v49  ;;  %v1258_v57 = vpop.eup %1037  ;;  %v608_v61 = vmul.f32 %v1255_v55, %v1229_v37  ;;  %vm613_vm3 = vweird.f32 %v1255_v55  ;;  %v633_v37 = vand.u32 2147483648, %v1244_v47 }
  0xb0   : > { %v435_v36 = vpop.f32.mrf.mxu2  ;;  %1047 = vpow2.f32 %v972_v50  ;;  %v1040_v60 = vpop.eup %1039  ;;  %v698_v0 = vmul.f32 %v1258_v57, %v1231_v40  ;;  %vm703_vm4 = vweird.f32 %v1258_v57  ;;  %vm1357_vm7 = vmor %vm612_vm1, %vm613_vm3  ;;  %vm717_vm14 = vweird.f32 %v1246_v49 }
  0xb1   : > { %v1252_v52 = vadd.f32 %v1200_v15, %v435_v36  ;;  %v450_v56 = vpop.f32.mrf.mxu3  ;;  %1049 = vpow2.f32 %v966_v51  ;;  %v1268_v63 = vpop.eup %1041  ;;  %v1285_v8 = vadd.f32 1.0, %v1040_v60  ;;  %v609_v11 = vsub.f32 1.0, %v608_v61  ;;  %vm1368_vm8 = vmor %vm702_vm2, %vm703_vm4 }
  0xb2   : > { %v423_v48 = vpop.f32.mrf.mxu0  ;;  %v1266_v62 = vadd.f32 %v1200_v15, %v450_v56  ;;  %v699_v17 = vsub.f32 1.0, %v698_v0  ;;  %v1305_v29 = vmul.f32 %v1268_v63, %v1237_v45 }
  0xb3   : > { %v967_v59 = vmul.f32 -1.442695, %v1252_v52  ;;  %v1301_v27 = vadd.f32 %v1200_v15, %v423_v48  ;;  %v610_v33 = vmul.f32 %v1255_v55, %v609_v11 }
  0xb4   : > { %v1275_v2 = vpop.eup %1043  ;;  %v973_v4 = vmul.f32 -1.442695, %v1266_v62  ;;  %v700_v39 = vmul.f32 %v1258_v57, %v699_v17  ;;  %v519_v51 = vsub.f32 1.0, %v1305_v29 }
  0xb5   : > { %1051 = vpow2.f32 %v967_v59  ;;  %v1281_v6 = vpop.eup %1045  ;;  %v623_v23 = vmul.f32 %v1275_v2, %v1244_v47  ;;  %v962_v50 = vmul.f32 -1.442695, %v1301_v27  ;;  %v611_v61 = vadd.f32 %v1255_v55, %v610_v33 }
  0xb6   : > { %1053 = vrcp.f32 %v1260_v58  ;;  %v1048_v9 = vpop.eup %1047  ;;  %v713_v31 = vmul.f32 %v1281_v6, %v1246_v49  ;;  %vm628_vm9 = vweird.f32 %v1275_v2  ;;  %vm718_vm10 = vweird.f32 %v1281_v6 }
  0xb7   : > { %v1050_v14 = vpop.eup %1049  ;;  %v1290_v19 = vadd.f32 1.0, %v1048_v9  ;;  %1055 = vpow2.f32 %v973_v4  ;;  %v624_v48 = vsub.f32 1.0, %v623_v23  ;;  %v701_v4 = vadd.f32 %v1258_v57, %v700_v39  ;;  %vm1411_vm13 = vmor %vm627_vm11, %vm628_vm9 }
  0xb8   : > { %v438_v54 = vpop.f32.mrf.mxu2  ;;  %1057 = vrcp.f32 %v1285_v8  ;;  %v1314_v36 = vadd.f32 1.0, %v1050_v14  ;;  %v631_v23 = vand.u32 2147483647, %v1244_v47  ;;  %v615_v33 = vsel %vm1357_vm7, %v1255_v55, %v611_v61  ;;  %vm1430_vm0 = vmor %vm717_vm14, %vm718_vm10 }
  0xb9   : > { %v1273_v1 = vadd.f32 %v1200_v15, %v438_v54  ;;  %1059 = vrcp.f32 %v1290_v19  ;;  %v714_v54 = vsub.f32 1.0, %v713_v31  ;;  %v625_v13 = vmul.f32 %v1275_v2, %v624_v48 }
  0xba   : > { %v425_v5 = vpop.f32.mrf.mxu0  ;;  %v721_v31 = vand.u32 2147483647, %v1246_v49  ;;  %v705_v39 = vsel %vm1368_vm8, %v1258_v57, %v701_v4  ;;  %vm1400_vm12 = vcmp.eq.f32.partialorder %v631_v23, 8.507059e+37  ;;  %v723_v61 = vand.u32 2147483648, %v1246_v49 }
  0xbb   : > { %v968_v20 = vmul.f32 -1.442695, %v1273_v1  ;;  %v1294_v22 = vadd.f32 %v1200_v15, %v425_v5  ;;  %v1052_v32 = vpop.eup %1051  ;;  %v626_v43 = vadd.f32 %v1275_v2, %v625_v13  ;;  %v1423_v17 = vsel %vm1338_vm5, %v1312_v34, %v615_v33 }
  0xbc   : > { %v1317_v38 = vpop.eup %1053  ;;  %v1328_v56 = vadd.f32 1.0, %v1052_v32  ;;  %vm1416_vm15 = vcmp.eq.f32.partialorder %v721_v31, 8.507059e+37  ;;  %v724_v29 = vor.u32 1.1754944e-38, %v723_v61  ;;  %v738_v13 = vand.u32 2147483648, %v1290_v19 }
  0xbd   : > { %1061 = vpow2.f32 %v968_v20  ;;  %v963_v41 = vmul.f32 -1.442695, %v1294_v22  ;;  %v1056_v59 = vpop.eup %1055  ;;  %v709_v20 = vor.u32 1.1754944e-38, %v708_v53  ;;  %v630_v11 = vsel %vm1411_vm13, %v1275_v2, %v626_v43 }
  0xbe   : > { %1063 = vpow2.f32 %v961_v26  ;;  %v1335_v60 = vpop.eup %1057  ;;  %v1351_v14 = vadd.f32 1.0, %v1056_v59  ;;  %v715_v26 = vmul.f32 %v1281_v6, %v714_v54  ;;  %v1397_v59 = vmul.f32 %v1268_v63, %v519_v51 }
  0xbf   : > { %1065 = vrcp.f32 %v1314_v36  ;;  %v1344_v9 = vpop.eup %1059  ;;  %v548_v57 = vmul.f32 %v1335_v60, %v1285_v8  ;;  %v634_v51 = vor.u32 1.1754944e-38, %v633_v37  ;;  %vm732_vm1 = vweird.f32 %v1290_v19 }
  0xc0   : > { %v440_v28 = vpop.f32.mrf.mxu2  ;;  %1067 = vpow2.f32 %v963_v41  ;;  %v728_v48 = vmul.f32 %v1344_v9, %v1290_v19  ;;  %v716_v55 = vadd.f32 %v1281_v6, %v715_v26  ;;  %vm733_vm2 = vweird.f32 %v1344_v9 }
  0xc1   : > { %v1322_v42 = vadd.f32 %v1200_v15, %v440_v28  ;;  %v533_v15 = vmul.f32 %v1317_v38, %v1260_v58  ;;  %1069 = vpow2.f32 %v962_v50  ;;  %v549_v0 = vsub.f32 1.0, %v548_v57  ;;  %vm1510_vm7 = vmor %vm732_vm1, %vm733_vm2 }
  0xc2   : > { %1071 = vrcp.f32 %v1328_v56  ;;  %v729_v23 = vsub.f32 1.0, %v728_v48  ;;  %v720_v34 = vsel %vm1430_vm0, %v1281_v6, %v716_v55  ;;  %v648_v57 = vand.u32 2147483648, %v1314_v36 }
  0xc3   : > { %v969_v5 = vmul.f32 -1.442695, %v1322_v42  ;;  %v1062_v12 = vpop.eup %1061  ;;  %v534_v40 = vsub.f32 1.0, %v533_v15  ;;  %v1470_v55 = vmul.f32 %v1335_v60, %v549_v0  ;;  %vm657_vm5 = vweird.f32 %v1328_v56 }
  0xc4   : > { %v1064_v28 = vpop.eup %1063  ;;  %v1374_v32 = vadd.f32 1.0, %v1062_v12  ;;  %vm747_vm10 = vweird.f32 %v1351_v14  ;;  %vm642_vm11 = vweird.f32 %v1314_v36  ;;  %v751_v10 = vand.u32 2147483647, %v1351_v14 }
  0xc5   : > { %1073 = vpow2.f32 %v969_v5  ;;  %v1383_v41 = vpop.eup %1065  ;;  %v1393_v53 = vadd.f32 1.0, %v1064_v28  ;;  %v710_v5 = vsel %vm1346_vm6, %v709_v20, %v705_v39  ;;  %v1437_v26 = vmul.f32 %v1317_v38, %v534_v40 }
  0xc6   : > { %1075 = vrcp.f32 %v1351_v14  ;;  %v1068_v50 = vpop.eup %1067  ;;  %v1446_v28 = vmul.f32 %v710_v5, %v1206_v18  ;;  %v638_v37 = vmul.f32 %v1383_v41, %v1314_v36  ;;  %v1456_v39 = vsel %vm1400_vm12, %v634_v51, %v630_v11 }
  0xc7   : > { %1077 = vrcp.f32 %v1374_v32  ;;  %v1070_v54 = vpop.eup %1069  ;;  %v1434_v49 = vadd.f32 1.0, %v1068_v50  ;;  %v725_v18 = vsel %vm1416_vm15, %v724_v29, %v720_v34  ;;  %v730_v50 = vmul.f32 %v1344_v9, %v729_v23 }
  0xc8   : > { %v1405_v4 = vpop.eup %1071  ;;  %1079 = vrcp.f32 %v1393_v53  ;;  %v1450_v31 = vadd.f32 1.0, %v1070_v54  ;;  %v736_v54 = vand.u32 2147483647, %v1290_v19  ;;  %v639_v61 = vsub.f32 1.0, %v638_v37 }
  0xc9   : > { %v653_v40 = vmul.f32 %v1405_v4, %v1328_v56  ;;  %1081 = vrcp.f32 %v1434_v49  ;;  %v1481_v47 = vmul.f32 %v725_v18, %v1217_v25  ;;  %v731_v23 = vadd.f32 %v1344_v9, %v730_v50 }
  0xca   : > { %1083 = vrcp.f32 %v1450_v31  ;;  %v1489_v34 = vor.u32 1.1754944e-38, %v648_v57  ;;  %vm1500_vm3 = vcmp.eq.f32.partialorder %v736_v54, 8.507059e+37  ;;  %v739_v50 = vor.u32 1.1754944e-38, %v738_v13 }
  0xcb   : > { %v1074_v12 = vpop.eup %1073  ;;  %v654_v11 = vsub.f32 1.0, %v653_v40  ;;  %v640_v40 = vmul.f32 %v1383_v41, %v639_v61  ;;  %vm643_vm4 = vweird.f32 %v1383_v41  ;;  %vm658_vm6 = vweird.f32 %v1405_v4 }
  0xcc   : > { %v1443_v2 = vpop.eup %1075  ;;  %v1461_v43 = vadd.f32 1.0, %v1074_v12  ;;  %v646_v12 = vand.u32 2147483647, %v1314_v36  ;;  %v735_v13 = vsel %vm1510_vm7, %v1344_v9, %v731_v23  ;;  %vm672_vm12 = vweird.f32 %v1374_v32 }
  0xcd   : > { %v1452_v33 = vpop.eup %1077  ;;  %v743_v15 = vmul.f32 %v1443_v2, %v1351_v14  ;;  %v655_v57 = vmul.f32 %v1405_v4, %v654_v11  ;;  %vm748_vm8 = vweird.f32 %v1443_v2  ;;  %v676_v7 = vand.u32 2147483647, %v1374_v32 }
  0xce   : > { %v668_v48 = vmul.f32 %v1452_v33, %v1374_v32  ;;  %v1478_v51 = vpop.eup %1079  ;;  %1085 = vrcp.f32 %v1461_v43  ;;  %vm673_vm9 = vweird.f32 %v1452_v33  ;;  %v678_v9 = vand.u32 2147483648, %v1374_v32  ;;  %vm749_vm13 = vmor %vm747_vm10, %vm748_vm8 }
  0xcf   : > { %v744_v29 = vsub.f32 1.0, %v743_v15  ;;  %v1493_v37 = vpop.eup %1081  ;;  %v1498_v18 = vmul.f32 %v1478_v51, %v1393_v53  ;;  %v656_v15 = vadd.f32 %v1405_v4, %v655_v57  ;;  %vm1544_vm14 = vmor %vm672_vm12, %vm673_vm9  ;;  %v691_v21 = vand.u32 2147483647, %v1461_v43 }
  0xd0   : > { %v669_v5 = vsub.f32 1.0, %v668_v48  ;;  %v1516_v61 = vpop.eup %1083  ;;  %v593_v11 = vmul.f32 %v1493_v37, %v1434_v49  ;;  %vm752_vm15 = vcmp.eq.f32.partialorder %v751_v10, 8.507059e+37  ;;  %vm1553_vm0 = vcmp.eq.f32.partialorder %v646_v12, 8.507059e+37  ;;  %vm1575_vm12 = vmor %vm642_vm11, %vm643_vm4 }
  0xd1   : > { %v745_v54 = vmul.f32 %v1443_v2, %v744_v29  ;;  %v641_v10 = vadd.f32 %v1383_v41, %v640_v40  ;;  %v564_v30 = vsub.f32 1.0, %v1498_v18  ;;  %vm677_vm2 = vcmp.eq.f32.partialorder %v676_v7, 8.507059e+37 }
  0xd2   : > { %v670_v20 = vmul.f32 %v1452_v33, %v669_v5  ;;  %vm687_vm7 = vweird.f32 %v1461_v43  ;;  %vm552_vm8 = vweird.f32 %v1285_v8  ;;  %vm299_vm10 = vcmask 130048  }
  0xd3   : > { %v746_v29 = vadd.f32 %v1443_v2, %v745_v54  ;;  %v740_v54 = vsel %vm1500_vm3, %v739_v50, %v735_v13  ;;  %v594_v50 = vsub.f32 1.0, %v593_v11  ;;  %vm1565_vm3 = vmor %vm657_vm5, %vm658_vm6  ;;  %vm692_vm5 = vcmp.eq.f32.partialorder %v691_v21, 8.507059e+37 }
  0xd4   : > { %v671_v5 = vadd.f32 %v1452_v33, %v670_v20  ;;  %v1086_v19 = vpop.eup %1085  ;;  %v753_v20 = vand.u32 2147483648, %v1351_v14  ;;  %v578_v14 = vmul.f32 %v1516_v61, %v1450_v31  ;;  %v660_v40 = vsel %vm1565_vm3, %v1405_v4, %v656_v15 }
  0xd5   : > { %v683_v23 = vmul.f32 %v1086_v19, %v1461_v43  ;;  %v750_v6 = vsel %vm749_vm13, %v1443_v2, %v746_v29  ;;  %v693_v2 = vand.u32 2147483648, %v1461_v43  ;;  %vm688_vm1 = vweird.f32 %v1086_v19 }
  0xd6   : > { %v754_v25 = vor.u32 1.1754944e-38, %v753_v20  ;;  %v675_v48 = vsel %vm1544_vm14, %v1452_v33, %v671_v5  ;;  %v771_v20 = vmul.f32 %v740_v54, %v1235_v44  ;;  %v679_v33 = vor.u32 1.1754944e-38, %v678_v9  ;;  %vm689_vm9 = vmor %vm687_vm7, %vm688_vm1 }
  0xd7   : > { %v684_v0 = vsub.f32 1.0, %v683_v23  ;;  %v579_v12 = vsub.f32 1.0, %v578_v14  ;;  %v595_v43 = vmul.f32 %v1493_v37, %v594_v50  ;;  %v1111_v5 = vmov 0.0  }
  0xd8   : > { %v755_v57 = vsel %vm752_vm15, %v754_v25, %v750_v6  ;;  %v694_v25 = vor.u32 1.1754944e-38, %v693_v2  ;;  %300 = vst.msk [vmem:[#allocation2] sm:$0xff] %vm299_vm10, %v1111_v5  ;;  %v645_v36 = vsel %vm1575_vm12, %v1383_v41, %v641_v10  ;;  %v1779_v11 = vand.u32 2147483647, %v1328_v56 }
  0xd9   : > { %v685_v29 = vmul.f32 %v1086_v19, %v684_v0  ;;  %v772_v23 = vmul.f32 %v755_v57, %v1266_v62  ;;  %v680_v62 = vsel %vm677_vm2, %v679_v33, %v675_v48  ;;  %v1780_v9 = vand.u32 2147483648, %v1328_v56 }
  0xda   : > { %vm662_vm4 = vcmp.eq.f32.partialorder %v1779_v11, 8.507059e+37  ;;  %v580_v15 = vmul.f32 %v1516_v61, %v579_v12  ;;  %v767_v21 = vmul.f32 %v680_v62, %v1273_v1  ;;  %v788_v14 = vpack.c.bf16 %v1481_v47, %v1446_v28 }
  0xdb   : > { %v686_v0 = vadd.f32 %v1086_v19, %v685_v29  ;;  %v789_v44 = vpack.c.bf16 %v772_v23, %v771_v20  ;;  %v664_v54 = vor.u32 1.1754944e-38, %v1780_v9  ;;  %vm522_vm6 = vweird.f32 %v1237_v45 }
  0xdc   : > { %vm523_vm11 = vweird.f32 %v1268_v63  ;;  %v565_v41 = vmul.f32 %v1478_v51, %v564_v30  ;;  %vm582_vm13 = vweird.f32 %v1450_v31  ;;  %vm583_vm14 = vweird.f32 %v1516_v61 }
  0xdd   : > { %v690_v18 = vsel %vm689_vm9, %v1086_v19, %v686_v0  ;;  %790 = vmatpush.bf16.msra.mxu1 %v789_v44  ;;  %v665_v32 = vsel %vm662_vm4, %v664_v54, %v660_v40  ;;  %vm537_vm15 = vweird.f32 %v1260_v58  ;;  %v596_v1 = vadd.f32 %v1493_v37, %v595_v43  ;;  %vm1614_vm3 = vmor %vm582_vm13, %vm583_vm14 }
  0xde   : > { %v695_v4 = vsel %vm692_vm5, %v694_v25, %v690_v18  ;;  %vm597_vm1 = vweird.f32 %v1434_v49  ;;  %vm598_vm2 = vweird.f32 %v1493_v37  ;;  %v558_v56 = vand.u32 2147483648, %v1285_v8 }
  0xdf   : > { %v768_v19 = vmul.f32 %v695_v4, %v1322_v42  ;;  %v650_v30 = vsel %vm1553_vm0, %v1489_v34, %v645_v36  ;;  %v588_v28 = vand.u32 2147483648, %v1450_v31  ;;  %v603_v47 = vand.u32 2147483648, %v1434_v49  ;;  %vm1630_vm9 = vmor %vm597_vm1, %vm598_vm2 }
  0xe0   : > { %v766_v48 = vmul.f32 %v665_v32, %v1252_v52  ;;  %v581_v50 = vadd.f32 %v1516_v61, %v580_v15  ;;  %v586_v57 = vand.u32 2147483647, %v1450_v31  ;;  %v601_v29 = vand.u32 2147483647, %v1434_v49  ;;  %vm1687_vm2 = vmor %vm522_vm6, %vm523_vm11  ;;  %v1798_v32 = vld [vmem:[#allocation6_spill] sm:$0xff] }
  0xe1   : > { %791 = vmatpush.bf16.msra.mxu1 %v788_v14  ;;  %v787_v42 = vpack.c.bf16 %v768_v19, %v767_v21  ;;  %v764_v13 = vmul.f32 %v1456_v39, %v1214_v24  ;;  %v551_v34 = vadd.f32 %v1335_v60, %v1470_v55  ;;  %vm553_vm0 = vweird.f32 %v1335_v60 }
  0xe2   : > { %vm567_vm7 = vweird.f32 %v1393_v53  ;;  %v765_v31 = vmul.f32 %v650_v30, %v1241_v46  ;;  %v566_v20 = vadd.f32 %v1478_v51, %v565_v41  ;;  %vm568_vm12 = vweird.f32 %v1478_v51  ;;  %vm1644_vm5 = vmor %vm552_vm8, %vm553_vm0  ;;  %v1020_v41 = vld [vmem:[%s288_s13] ss:$0 sm:$0xff] }
  0xe3   : > { %v600_v24 = vsel %vm1630_vm9, %v1493_v37, %v596_v1  ;;  %v571_v39 = vand.u32 2147483647, %v1393_v53  ;;  %v573_v55 = vand.u32 2147483648, %v1393_v53  ;;  %v589_v49 = vor.u32 1.1754944e-38, %v588_v28  ;;  %vm1663_vm8 = vmor %vm567_vm7, %vm568_vm12  ;;  %v778_v28 = vld [vmem:[#allocation2] sm:$0xff] }
  0xe4   : > { %v604_v23 = vor.u32 1.1754944e-38, %v603_v47  ;;  %v585_v46 = vsel %vm1614_vm3, %v1516_v61, %v581_v50  ;;  %vm1651_vm4 = vcmp.eq.f32.partialorder %v586_v57, 8.507059e+37  ;;  %vm602_vm13 = vcmp.eq.f32.partialorder %v601_v29, 8.507059e+37  ;;  %v1021_v50 = vld [vmem:[%s1744_s4] ss:$0 sm:$0xff] }
  0xe5   : > { %792 = vmatpush.bf16.msra.mxu1 %v787_v42  ;;  %v786_v37 = vpack.c.bf16 %v766_v48, %v765_v31  ;;  %v521_v6 = vadd.f32 %v1268_v63, %v1397_v59  ;;  %v541_v12 = vand.u32 2147483647, %v1260_v58  ;;  %v543_v0 = vand.u32 2147483648, %v1260_v58 }
  0xe6   : > { %v605_v61 = vsel %vm602_vm13, %v604_v23, %v600_v24  ;;  %v763_v62 = vmul.f32 %v1423_v17, %v1203_v16  ;;  %v536_v25 = vadd.f32 %v1317_v38, %v1437_v26  ;;  %vm538_vm14 = vweird.f32 %v1317_v38 }
  0xe7   : > { %v570_v59 = vsel %vm1663_vm8, %v1478_v51, %v566_v20  ;;  %v1791_v53 = vand.u32 2147483647, %v1285_v8  ;;  %v559_v40 = vor.u32 1.1754944e-38, %v558_v56  ;;  %v574_v43 = vor.u32 1.1754944e-38, %v573_v55  ;;  %vm539_vm0 = vmor %vm537_vm15, %vm538_vm14  ;;  %v1799_v56 = vld [vmem:[#allocation5_spill] sm:$0xff] }
  0xe8   : > { %v590_v16 = vsel %vm1651_vm4, %v589_v49, %v585_v46  ;;  %v555_v8 = vsel %vm1644_vm5, %v1335_v60, %v551_v34  ;;  %vm572_vm3 = vcmp.eq.f32.partialorder %v571_v39, 8.507059e+37  ;;  %v762_v26 = vmul.f32 %v605_v61, %v1294_v22 }
  0xe9   : > { %793 = vmatpush.bf16.msra.mxu1 %v786_v37  ;;  %vm1677_vm1 = vcmp.eq.f32.partialorder %v1791_v53, 8.507059e+37  ;;  %v785_v51 = vpack.c.bf16 %v764_v13, %v763_v62  ;;  %v575_v18 = vsel %vm572_vm3, %v574_v43, %v570_v59  ;;  %v1796_v36 = vand.u32 2147483647, %v1237_v45 }
  0xea   : > { %v540_v11 = vsel %vm539_vm0, %v1317_v38, %v536_v25  ;;  %v761_v9 = vmul.f32 %v590_v16, %v1301_v27  ;;  %v1797_v54 = vand.u32 2147483648, %v1237_v45  ;;  %v544_v4 = vor.u32 1.1754944e-38, %v543_v0 }
  0xeb   : > { %vm527_vm7 = vcmp.eq.f32.partialorder %v1796_v36, 8.507059e+37  ;;  %v560_v22 = vsel %vm1677_vm1, %v559_v40, %v555_v8  ;;  %v773_v15 = vlaneseq  ;;  %v525_v58 = vsel %vm1687_vm2, %v1268_v63, %v521_v6 }
  0xec   : > { %v529_v60 = vor.u32 1.1754944e-38, %v1797_v54  ;;  %vm542_vm6 = vcmp.eq.f32.partialorder %v541_v12, 8.507059e+37  ;;  %v760_v21 = vmul.f32 %v575_v18, %v1278_v3  ;;  %v784_v38 = vpack.c.bf16 %v762_v26, %v761_v9 }
  0xed   : > { %794 = vmatpush.bf16.msra.mxu1 %v785_v51  ;;  %v545_v19 = vsel %vm542_vm6, %v544_v4, %v540_v11  ;;  %v759_v27 = vmul.f32 %v560_v22, %v1227_v35  ;;  %v774_v45 = vshrl.u32 %v773_v15, 7  ;;  %v1112_v30 = vmov 1.0|1.0  }
  0xee   : > { %v530_v14 = vsel %vm527_vm7, %v529_v60, %v525_v58  ;;  %v758_v1 = vmul.f32 %v545_v19, %v1798_v32  ;;  %vm301_vm9 = vcmask 7168  }
  0xef   : > { %v783_v42 = vpack.c.bf16 %v760_v21, %v759_v27  ;;  %v757_v63 = vmul.f32 %v530_v14, %v1799_v56  ;;  %vm777_vm11 = vcmp.eq.s32.totalorder %v774_v45, %v1020_v41  ;;  %302 = vst.msk [vmem:[#allocation3] sm:$0xff] %vm301_vm9, %v1111_v5 }
  0xf0   : > { %vm975_vm15 = vmpackc.low %vm777_vm11, %vm777_vm11  ;;  %v974_v35 = vsel %vm777_vm11, 1.0, %v1111_v5  ;;  %v1022_v5 = vld [vmem:[#allocation4] ss:$0 sm:$0xff] }
  0xf1   : > { %795 = vmatpush.bf16.msra.mxu1 %v784_v38  ;;  %v782_v3 = vpack.c.bf16 %v758_v1, %v757_v63  ;;  %807 = vadd.xlane.f32.xlu0 %v974_v35 }
  0xf5   : > { %796 = vmatpush.bf16.msra.mxu1 %v783_v42 }
  0xf6   : > { %v806_v34 = vld [vmem:[#allocation3] sm:$0xff] }
  0xf9   : > { %797 = vmatpush.bf16.msra.mxu1 %v782_v3 }
  0xfc   : > { %976 = vmatmul.msk.bf16.vlgmr.msra.gmra.mxu1 %vm975_vm15, %v1112_v30 }
 0x164   : > { %v808_v52 = vpop.xlane.xlu0 %807 }
 0x165   : > { %v809_v31 = vadd.f32 %v808_v52, %v806_v34 }
 0x167   : > { %811 = vst.msk [vmem:[#allocation3] sm:$0xff] %vm301_vm9, %v809_v31 }
 0x16e   : > { %v824_v20 = vld [vmem:[#allocation3] sm:$0xff] }
 0x16f   : > { %v829_v24 = vmul.f32 %v1022_v5, %v824_v20 }
 0x179   : > { %v799_v47 = vpop.f32.mrf.mxu1 }
 0x17a   : > { %v803_v48 = vadd.f32 %v799_v47, %v778_v28 }
 0x17c   : > { %805 = vst.msk [vmem:[#allocation2] sm:$0xff] %vm299_vm10, %v803_v48 }
 0x181   : > { %v801_v2 = vpop.f32.mrf.mxu1 }
 0x183   : > { %v815_v57 = vld [vmem:[#allocation2] sm:$0xff] }
 0x184   : > { %v820_v29 = vmul.f32 %v1021_v50, %v815_v57 }
 0x186   : > { %v821_v13 = vsel %vm299_vm10, %v820_v29, 0.0 }
 0x187   : > { %822 = vadd.xlane.f32.xlu0 %v821_v13 }
 0x1fa   : > { %v823_v39 = vpop.xlane.xlu0 %822 }
 0x1fb   : > { %v830_v55 = vadd.f32 %v829_v24, %v823_v39 }
 0x1fd   : > { %831 = vst.msk [vmem:[%s293_s26] sm:$0xff] %vm301_vm9, %v830_v55 }
 0x1fe PF: > { %s18_s25 = sadd.s32 1, %s1109_s25   ;;  %s1800_s23 = smov %s1105_s24 }
 0x1ff   : > { %p15_p6 = scmp.ge.s32.totalorder %s18_s25, 4   ;;  %s1801_s24 = smov %s1803_s5 }
 0x201   :  { %17 = sbr.rel (!%p15_p6) target bundleno = 3 (0x3), region = 85 }

</bundles_post_ra>
